<compile_context>
chip_gen: v7x
topology: tpu7x:2x2x1
jax: 0.10.0
libtpu: 0.0.40
codegen_flags: <defaults>
</compile_context>

<pallas_src>
import jax
import jax.numpy as jnp
from jax.experimental import pallas as pl
from jax.experimental.pallas import tpu as pltpu

SMOOTH = 1.0
_TARGET_TILE_BYTES = 2 << 20  # ~2 MiB per input tile (f32 sizing)


def _choose_tile_rows(R, lanes):
    """Largest row-tile that (a) divides R, (b) is a multiple of 8 (or == R),
    and (c) keeps one f32 tile under the VMEM target. Guarantees exact grid
    coverage (no partial blocks, no masking)."""
    if R % 8 != 0:
        return R  # block (tile_r, lanes): dims must be mult-of-8/128 or full dims
    best = 8
    tr = 8
    while tr <= R:
        if R % tr == 0 and tr * lanes * 4 <= _TARGET_TILE_BYTES:
            best = tr
        tr += 8
    return best


def _dice_kernel(p_ref, t_ref, pt_out_ref, s_out_ref, acc_pt, acc_s):
    """Grid = (N, R // TILE_R); each step sees a (TILE_R, L) slab of channel 0.

    p_ref, t_ref         : (TILE_R, L) VMEM tiles of y_pred / y_true (native dtype)
    pt_out_ref, s_out_ref: (SUB, L) f32 per-batch partial-sum outputs
    acc_pt, acc_s        : (SUB, L) f32 VMEM accumulators (carried over the r axis)
    """
    r_id = pl.program_id(1)

    @pl.when(r_id == 0)
    def _():
        acc_pt[...] = jnp.zeros_like(acc_pt)
        acc_s[...] = jnp.zeros_like(acc_s)

    p = p_ref[...].astype(jnp.float32)
    t = t_ref[...].astype(jnp.float32)
    pt = p * t        # intersection contribution
    s = p + t         # merged sum_p + sum_t contribution

    tile_r, lanes = p_ref.shape
    sub = acc_pt.shape[0]
    if tile_r == sub:
        # Tile is already accumulator-sized.
        acc_pt[...] += pt
        acc_s[...] += s
    else:
        # Row reduction via leading-axis sum: vreg-wise VALU adds, no XLU.
        acc_pt[...] += pt.reshape(tile_r // sub, sub, lanes).sum(axis=0)
        acc_s[...] += s.reshape(tile_r // sub, sub, lanes).sum(axis=0)

    @pl.when(r_id == pl.num_programs(1) - 1)
    def _():
        pt_out_ref[...] = acc_pt[...]
        s_out_ref[...] = acc_s[...]


def dice_loss(y_pred, y_true):
    """Pallas equivalent of DiceLoss().forward(y_pred, y_true) for NCHW inputs."""
    assert y_pred.shape == y_true.shape
    assert y_pred.ndim == 4, "expects NCHW inputs, like the PyTorch module"
    N, C, H, W = y_pred.shape
    total = H * W

    # Lane-dense view of the channel-0 spatial data. For contiguous NCHW the
    # reshape (N, C, H, W) -> (N, C, R, L) is a free, layout-preserving
    # metadata change; channel 0 of each batch stays one contiguous slab.
    lanes = None
    for cand in (512, 384, 256, 128):
        if total % cand == 0:
            lanes = cand
            break
    if lanes is not None:
        R = total // lanes
        yp = y_pred.reshape(N, C, R, lanes)
        yt = y_true.reshape(N, C, R, lanes)
    else:
        # Fallback: tile the raw (H, W) layout (lane-sparse but correct).
        R, lanes = H, W
        yp, yt = y_pred, y_true

    tile_r = _choose_tile_rows(R, lanes)
    sub = 8 if tile_r % 8 == 0 else tile_r
    num_r_tiles = R // tile_r

    # Channel-0 selection happens in the index_map (block index 0 on the C
    # axis); N and C are squeezed so the kernel sees clean (TILE_R, L) tiles.
    in_block = (None, None, tile_r, lanes)
    in_map = lambda n, r: (n, 0, r, 0)
    out_block = (None, sub, lanes)
    out_map = lambda n, r: (n, 0, 0)

    # Explicit VMEM budget (v5e scoped default is 16 MiB): 2 inputs x 2
    # buffers x tile, plus the tiny partial-sum outputs and scratch.
    itemsize = jnp.dtype(y_pred.dtype).itemsize
    in_tile_bytes = tile_r * lanes * itemsize
    part_bytes = sub * lanes * 4
    needed = 2 * 2 * in_tile_bytes + 2 * 2 * part_bytes + 2 * part_bytes
    vmem_limit = int(min(max(2 * needed, 16 << 20), 40 << 20))

    pt_part, s_part = pl.pallas_call(
        _dice_kernel,
        out_shape=(
            jax.ShapeDtypeStruct((N, sub, lanes), jnp.float32),
            jax.ShapeDtypeStruct((N, sub, lanes), jnp.float32),
        ),
        grid_spec=pltpu.PrefetchScalarGridSpec(
            num_scalar_prefetch=0,
            grid=(N, num_r_tiles),
            in_specs=[
                pl.BlockSpec(in_block, in_map),
                pl.BlockSpec(in_block, in_map),
            ],
            out_specs=[
                pl.BlockSpec(out_block, out_map),
                pl.BlockSpec(out_block, out_map),
            ],
            scratch_shapes=[
                pltpu.VMEM((sub, lanes), jnp.float32),
                pltpu.VMEM((sub, lanes), jnp.float32),
            ],
        ),
        compiler_params=pltpu.CompilerParams(
            # N axis is independent per batch -> parallel (uses both TCs on
            # v7x); the r (reduction) axis carries the accumulators -> arbitrary.
            dimension_semantics=("parallel", "arbitrary"),
            vmem_limit_bytes=vmem_limit,
        ),
    )(yp, yt)

    # Final 3-scalar dice math on the tiny per-batch partials (XLA, negligible).
    inter = jnp.sum(pt_part)
    sum_s = jnp.sum(s_part)
    dsc = (2.0 * inter + SMOOTH) / (sum_s + SMOOTH)
    return 1.0 - dsc


def dice_loss_ref(y_pred, y_true):
    p = y_pred[:, 0].reshape(-1).astype(jnp.float32)
    t = y_true[:, 0].reshape(-1).astype(jnp.float32)
    inter = jnp.sum(p * t)
    dsc = (2.0 * inter + SMOOTH) / (jnp.sum(p) + jnp.sum(t) + SMOOTH)
    return 1.0 - dsc


if __name__ == "__main__":
    key = jax.random.PRNGKey(0)
    k1, k2 = jax.random.split(key)
    shape = (2, 4, 16, 16)  # NCHW, as the PyTorch module expects
    y_pred = jax.nn.sigmoid(jax.random.normal(k1, shape, dtype=jnp.float32))
    y_true = (jax.random.uniform(k2, shape) > 0.5).astype(jnp.float32)

    loss = jax.block_until_ready(dice_loss(y_pred, y_true))
    ref = jax.block_until_ready(dice_loss_ref(y_pred, y_true))
    assert jnp.allclose(loss, ref, atol=1e-5, rtol=1e-5), (loss, ref)

    print("KERNEL_OK")
</pallas_src>

<mosaic_0001>
module attributes {stable_mosaic.version = 11 : i64} {
  func.func @_dice_kernel(%arg0: i32, %arg1: i32, %arg2: memref<1x1x1x256xf32, #tpu.memory_space<vmem>>, %arg3: memref<1x1x1x256xf32, #tpu.memory_space<vmem>>, %arg4: memref<1x1x256xf32, #tpu.memory_space<vmem>>, %arg5: memref<1x1x256xf32, #tpu.memory_space<vmem>>, %arg6: memref<1x256xf32, #tpu.memory_space<vmem>>, %arg7: memref<1x256xf32, #tpu.memory_space<vmem>>) attributes {dimension_semantics = [#tpu.dimension_semantics<parallel>, #tpu.dimension_semantics<arbitrary>], iteration_bounds = array<i64: 2, 1>, scalar_prefetch = 0 : i64, scratch_operands = 2 : i64, tpu.core_type = #tpu.core_type<tc>, window_params = [{transform_indices = @transform_0, window_bounds = array<i64: 1, 1, 1, 256>}, {transform_indices = @transform_1, window_bounds = array<i64: 1, 1, 1, 256>}, {transform_indices = @transform_2, window_bounds = array<i64: 1, 1, 256>}, {transform_indices = @transform_3, window_bounds = array<i64: 1, 1, 256>}]} {
    %c0_i32 = arith.constant 0 : i32
    %0 = arith.cmpi eq, %arg1, %c0_i32 : i32
    %1 = arith.extui %0 : i1 to i32
    %c0_i32_0 = arith.constant 0 : i32
    %2 = arith.cmpi ne, %1, %c0_i32_0 : i32
    scf.if %2 {
      %cst = arith.constant 0.000000e+00 : f32
      %18 = vector.broadcast %cst : f32 to vector<1x256xf32>
      %c0_18 = arith.constant 0 : index
      %c0_19 = arith.constant 0 : index
      %19 = vector.load %arg6[%c0_18, %c0_19] : memref<1x256xf32, #tpu.memory_space<vmem>>, vector<1x256xf32>
      tpu.vector_store %arg6[%c0_18, %c0_19], %18 {strides = array<i32>} : memref<1x256xf32, #tpu.memory_space<vmem>>, vector<1x256xf32>,
      %cst_20 = arith.constant 0.000000e+00 : f32
      %20 = vector.broadcast %cst_20 : f32 to vector<1x256xf32>
      %c0_21 = arith.constant 0 : index
      %c0_22 = arith.constant 0 : index
      %21 = vector.load %arg7[%c0_21, %c0_22] : memref<1x256xf32, #tpu.memory_space<vmem>>, vector<1x256xf32>
      tpu.vector_store %arg7[%c0_21, %c0_22], %20 {strides = array<i32>} : memref<1x256xf32, #tpu.memory_space<vmem>>, vector<1x256xf32>,
    } else {
    }
    %c0 = arith.constant 0 : index
    %c0_1 = arith.constant 0 : index
    %c0_2 = arith.constant 0 : index
    %c0_3 = arith.constant 0 : index
    %3 = vector.load %arg2[%c0, %c0_1, %c0_2, %c0_3] : memref<1x1x1x256xf32, #tpu.memory_space<vmem>>, vector<1x1x1x256xf32>
    %4 = vector.shape_cast %3 : vector<1x1x1x256xf32> to vector<1x256xf32>
    %c0_4 = arith.constant 0 : index
    %c0_5 = arith.constant 0 : index
    %c0_6 = arith.constant 0 : index
    %c0_7 = arith.constant 0 : index
    %5 = vector.load %arg3[%c0_4, %c0_5, %c0_6, %c0_7] : memref<1x1x1x256xf32, #tpu.memory_space<vmem>>, vector<1x1x1x256xf32>
    %6 = vector.shape_cast %5 : vector<1x1x1x256xf32> to vector<1x256xf32>
    %7 = arith.mulf %4, %6 : vector<1x256xf32>
    %8 = arith.addf %4, %6 : vector<1x256xf32>
    %c0_8 = arith.constant 0 : index
    %c0_9 = arith.constant 0 : index
    %9 = vector.load %arg6[%c0_8, %c0_9] : memref<1x256xf32, #tpu.memory_space<vmem>>, vector<1x256xf32>
    %10 = arith.addf %9, %7 : vector<1x256xf32>
    %c0_10 = arith.constant 0 : index
    %c0_11 = arith.constant 0 : index
    %11 = vector.load %arg6[%c0_10, %c0_11] : memref<1x256xf32, #tpu.memory_space<vmem>>, vector<1x256xf32>
    tpu.vector_store %arg6[%c0_10, %c0_11], %10 {strides = array<i32>} : memref<1x256xf32, #tpu.memory_space<vmem>>, vector<1x256xf32>,
    %c0_12 = arith.constant 0 : index
    %c0_13 = arith.constant 0 : index
    %12 = vector.load %arg7[%c0_12, %c0_13] : memref<1x256xf32, #tpu.memory_space<vmem>>, vector<1x256xf32>
    %13 = arith.addf %12, %8 : vector<1x256xf32>
    %c0_14 = arith.constant 0 : index
    %c0_15 = arith.constant 0 : index
    %14 = vector.load %arg7[%c0_14, %c0_15] : memref<1x256xf32, #tpu.memory_space<vmem>>, vector<1x256xf32>
    tpu.vector_store %arg7[%c0_14, %c0_15], %13 {strides = array<i32>} : memref<1x256xf32, #tpu.memory_space<vmem>>, vector<1x256xf32>,
    %c0_i32_16 = arith.constant 0 : i32
    %15 = arith.cmpi eq, %arg1, %c0_i32_16 : i32
    %16 = arith.extui %15 : i1 to i32
    %c0_i32_17 = arith.constant 0 : i32
    %17 = arith.cmpi ne, %16, %c0_i32_17 : i32
    scf.if %17 {
      %c0_18 = arith.constant 0 : index
      %c0_19 = arith.constant 0 : index
      %18 = vector.load %arg6[%c0_18, %c0_19] : memref<1x256xf32, #tpu.memory_space<vmem>>, vector<1x256xf32>
      %c0_20 = arith.constant 0 : index
      %c0_21 = arith.constant 0 : index
      %c0_22 = arith.constant 0 : index
      %19 = vector.load %arg4[%c0_20, %c0_21, %c0_22] : memref<1x1x256xf32, #tpu.memory_space<vmem>>, vector<1x1x256xf32>
      %20 = vector.shape_cast %19 : vector<1x1x256xf32> to vector<1x256xf32>
      %21 = vector.shape_cast %18 : vector<1x256xf32> to vector<1x1x256xf32>
      tpu.vector_store %arg4[%c0_20, %c0_21, %c0_22], %21 {strides = array<i32>} : memref<1x1x256xf32, #tpu.memory_space<vmem>>, vector<1x1x256xf32>,
      %c0_23 = arith.constant 0 : index
      %c0_24 = arith.constant 0 : index
      %22 = vector.load %arg7[%c0_23, %c0_24] : memref<1x256xf32, #tpu.memory_space<vmem>>, vector<1x256xf32>
      %c0_25 = arith.constant 0 : index
      %c0_26 = arith.constant 0 : index
      %c0_27 = arith.constant 0 : index
      %23 = vector.load %arg5[%c0_25, %c0_26, %c0_27] : memref<1x1x256xf32, #tpu.memory_space<vmem>>, vector<1x1x256xf32>
      %24 = vector.shape_cast %23 : vector<1x1x256xf32> to vector<1x256xf32>
      %25 = vector.shape_cast %22 : vector<1x256xf32> to vector<1x1x256xf32>
      tpu.vector_store %arg5[%c0_25, %c0_26, %c0_27], %25 {strides = array<i32>} : memref<1x1x256xf32, #tpu.memory_space<vmem>>, vector<1x1x256xf32>,
    } else {
    }
    return
  }
  func.func @transform_0(%arg0: i32, %arg1: i32) -> (i32, i32, i32, i32) {
    %c0_i32 = arith.constant 0 : i32
    %c0_i32_0 = arith.constant 0 : i32
    %c0_i32_1 = arith.constant 0 : i32
    return %arg0, %c0_i32, %arg1, %c0_i32_0 : i32, i32, i32, i32
  }
  func.func @transform_1(%arg0: i32, %arg1: i32) -> (i32, i32, i32, i32) {
    %c0_i32 = arith.constant 0 : i32
    %c0_i32_0 = arith.constant 0 : i32
    %c0_i32_1 = arith.constant 0 : i32
    return %arg0, %c0_i32, %arg1, %c0_i32_0 : i32, i32, i32, i32
  }
  func.func @transform_2(%arg0: i32, %arg1: i32) -> (i32, i32, i32) {
    %c0_i32 = arith.constant 0 : i32
    %c0_i32_0 = arith.constant 0 : i32
    %c0_i32_1 = arith.constant 0 : i32
    return %arg0, %c0_i32, %c0_i32_0 : i32, i32, i32
  }
  func.func @transform_3(%arg0: i32, %arg1: i32) -> (i32, i32, i32) {
    %c0_i32 = arith.constant 0 : i32
    %c0_i32_0 = arith.constant 0 : i32
    %c0_i32_1 = arith.constant 0 : i32
    return %arg0, %c0_i32, %c0_i32_0 : i32, i32, i32
  }
}

</mosaic_0001>

<bundles_post_ra>
// kernel: tpu_custom_call.1
= control target key start
LH: loop header
LB: loop body
LE: loop exit
PB: predicated region body
PF: predicated region fallthrough
CT: control target
= control target key end

     0   :  { %9 = vsyncpa [#allocation5], 0  ;;  %s1036_s0 = inlined_call_operand.hbm [shape: f32[2,4,1,256], index: 0, kind: input, shape index: {}]   ;;  %s1037_s1 = inlined_call_operand.hbm [shape: f32[2,4,1,256], index: 1, kind: input, shape index: {}]   ;;  %s1038_s2 = inlined_call_operand.hbm [shape: f32[2,1,256], index: 2, kind: output, shape index: {0}]   ;;  %s1039_s3 = inlined_call_operand.hbm [shape: f32[2,1,256], index: 3, kind: output, shape index: {1}]  }
   0x1   :  { %11 = vsyncpa [#allocation5 + $0x1], 0 }
   0x2   :  { %12 = vsyncpa [#allocation8], 0 }
   0x3   :  { %14 = vsyncpa [#allocation8 + $0x1], 0 }
   0x4   :  { %15 = vsyncpa [#allocation6], 0 }
   0x5   :  { %17 = vsyncpa [#allocation6 + $0x1], 0 }
   0x6   :  { %18 = vsyncpa [#allocation11], 0 }
   0x7   :  { %20 = vsyncpa [#allocation11 + $0x1], 0  ;;  %s765_s12 = smov 0   ;;  %s767_s13 = smov 0  }
   0x8   :  { %s769_s14 = smov 0   ;;  %s771_s15 = smov 0  }
   0x9   :  { %s773_s16 = smov 0   ;;  %s775_s17 = smov 0  }
   0xa LB: > { %s460_s18 = sadd.s32 4294967295, %s738_s17   ;;  %s461_s19 = sadd.s32 4294967294, %s738_s17   ;;  %s738_s17 = sphi %s775_s17, %s26_s17   ;;  %s734_s16 = sphi %s773_s16, %s1061_s16   ;;  %s730_s15 = sphi %s771_s15, %s1060_s15   ;;  %s726_s14 = sphi %s769_s14, %s1059_s14   ;;  %s722_s13 = sphi %s767_s13, %s1058_s13   ;;  %s718_s12 = sphi %s765_s12, %s1057_s12  }
   0xb   : > { %s38_s20 = sadd.s32 1, %s734_s16  ;;  %s47_s21 = sadd.s32 1, %s726_s14 }
   0xc   : > { %p40_p0 = scmp.ge.s32.totalorder %s38_s20, 2  ;;  %p54_p1 = scmp.ne.s32.totalorder %s726_s14, %s722_s13 }
   0xd   : > { %p55_p2 = scmp.eq.s32.totalorder %s738_s17, 0  ;;  %p60_p3 = scmp.ne.s32.totalorder %s722_s13, %s718_s12 }
   0xe   : > { %s1063_s20 = smov (%p40_p0, %s38_s20), 0  ;;  %p61_p5 = scmp.eq.s32.totalorder %s460_s18, 0 }
   0xf   : > { %p806_p4 = por %p55_p2, %p54_p1  ;;  %s42_s23 = ssub.s32 %s734_s16, %s1063_s20 }
  0x10   : > { %p112_p6 = scmp.eq.s32.totalorder %s460_s18, 1  ;;  %p45_p7 = scmp.eq.s32.totalorder %s42_s23, 0 }
  0x11   : > { %p812_p8 = por %p61_p5, %p60_p3  ;;  %p118_p10 = scmp.eq.s32.totalorder %s461_s19, 1 }
  0x12   : > { %p816_p9 = por %p112_p6, %p54_p1  ;;  %p509_p13 = scmp.lt.s32.totalorder %s738_s17, 2 }
  0x13   : > { %s1043_s24 = scalar_select %p812_p8, 1, 0 }
  0x14   : > { %s1044_s25 = scalar_select %p816_p9, 1, 0 }
  0x15   : > { %s821_s26 = scalar_select %p45_p7, %s726_s14, %s47_s21  }
  0x16   : > { %p823_p11 = por %p118_p10, %p60_p3  ;;  %s830_s28 = sand.u32 1, %s726_s14  }
  0x17   : > { %s464_s29 = sshll.u32 %s830_s28, 1  ;;  %s483_s30 = sshll.u32 %s734_s16, 7 }
  0x18   : > { %s1045_s27 = scalar_select %p823_p11, 1, 0 }
  0x19   : > { %s839_s6 = scalar_lea.hbm %s1036_s0, %s483_s30  ;;  %s168_s7 = scalar_lea.vmem [#allocation4], %s464_s29 }
  0x1a   : > { %s178_s8 = sshll.u32 %s168_s7, 4  ;;  %p847_p0 = pnand %p509_p13, %p806_p4  ;;  %s843_s8 = int_to_ptr.vmem [resolvable:$true] %s178_s8 }
  0x1b   : > { %s165_s10 = scalar_lea.sflag [#allocation5], %s830_s28  ;;  %s560_s11 = scalar_lea.hbm %s839_s6, 32 }
  0x1c   : > { %p561_p3 = scmp.ne.s32.totalorder %s839_s6, %s560_s11  ;;  %p562_p5 = pneg %p847_p0 }
  0x1d   : > { %s565_s21 = scalar_lea.hbm %s1036_s0, 256  ;;  %p566_p4 = scmp.lt.u32.totalorder %s839_s6, %s1036_s0 }
  0x1e   : > { %p563_p6 = pnand %p562_p5, %p561_p3  ;;  %p567_p10 = scmp.lt.u32.totalorder %s565_s21, %s560_s11 }
  0x1f   : > { %p569_p12 = scmp.lt.u32.totalorder %s560_s11, %s839_s6 }
  0x20   : > { %p564_p7 = pneg %p563_p6  ;;  %p568_p13 = por %p567_p10, %p566_p4 }
  0x22   : > { %p570_p1 = por %p569_p12, %p568_p13 }
  0x24   : > { %p571_p2 = pnand %p570_p1, %p564_p7 }
  0x26   : > { %574 = shalt.err (!%p571_p2)
}
  0x27   : > { %s575_s4 = scalar_lea.vmem %s843_s8, 32  ;;  %s740_s5 = smov [#allocation4]  }
  0x28   : > { %p576_p3 = scmp.ne.s32.totalorder %s843_s8, %s575_s4  ;;  %s580_s7 = sshll.u32 %s740_s5, 4  ;;  %s581_s7 = int_to_ptr.vmem [resolvable:$false] %s580_s7 }
  0x29   : > { %s582_s18 = scalar_lea.vmem %s581_s7, 64  ;;  %p583_p9 = scmp.lt.s32.totalorder %s843_s8, %s581_s7 }
  0x2a   : > { %p578_p6 = pnand %p576_p3, %p562_p5  ;;  %p584_p4 = scmp.lt.s32.totalorder %s582_s18, %s575_s4 }
  0x2c   : > { %p579_p11 = pneg %p578_p6  ;;  %p585_p10 = por %p584_p4, %p583_p9 }
  0x2e   : > { %p586_p12 = pnand %p585_p10, %p579_p11 }
  0x30   : > { %589 = shalt.err (!%p586_p12)
}
  0x31   : > { %498 = dma.hbm_to_vmem [thread:$0]  (!%p847_p0), %s839_s6, 32, %s843_s8, %s165_s10  }
  0x32   : > { %p1047_p1 = scmp.lt.s32.totalorder %s738_s17, 3  ;;  %p1048_p2 = scmp.ge.s32.totalorder %s738_s17, 1 }
  0x33   : > { %s892_s22 = scalar_lea.hbm %s1037_s1, %s483_s30  ;;  %s189_s23 = scalar_lea.vmem [#allocation7], %s464_s29 }
  0x34   : > { %p883_p7 = pnand %p1048_p2, %p1047_p1  ;;  %s199_s4 = sshll.u32 %s189_s23, 4  ;;  %s200_s4 = int_to_ptr.vmem [resolvable:$true] %s199_s4 }
  0x35   : > { %s186_s6 = scalar_lea.sflag [#allocation8], %s830_s28  ;;  %s590_s8 = scalar_lea.hbm %s892_s22, 32 }
  0x36   : > { %s1049_s11 = scalar_select %p883_p7, 1, 0 }
  0x37   : > { %p591_p9 = scmp.ne.s32.totalorder %s892_s22, %s590_s8  ;;  %s595_s30 = scalar_lea.hbm %s1037_s1, 256 }
  0x38   : > { %p596_p3 = scmp.lt.u32.totalorder %s892_s22, %s1037_s1  ;;  %p597_p6 = scmp.lt.u32.totalorder %s595_s30, %s590_s8 }
  0x39   : > { %p593_p11 = pnand %p591_p9, %p562_p5  ;;  %p599_p10 = scmp.lt.u32.totalorder %s590_s8, %s892_s22 }
  0x3a   : > { %p598_p4 = por %p597_p6, %p596_p3 }
  0x3b   : > { %p594_p13 = pneg %p593_p11 }
  0x3c   : > { %p600_p12 = por %p599_p10, %p598_p4 }
  0x3e   : > { %p601_p1 = pnand %p600_p12, %p594_p13 }
  0x40   : > { %604 = shalt.err (!%p601_p1)
}
  0x41   : > { %s605_s28 = scalar_lea.vmem %s200_s4, 32  ;;  %s741_s29 = smov [#allocation7]  }
  0x42   : > { %p606_p2 = scmp.ne.s32.totalorder %s200_s4, %s605_s28  ;;  %s610_s19 = sshll.u32 %s741_s29, 4  ;;  %s611_s19 = int_to_ptr.vmem [resolvable:$false] %s610_s19 }
  0x43   : > { %s612_s21 = scalar_lea.vmem %s611_s19, 64  ;;  %p613_p8 = scmp.lt.s32.totalorder %s200_s4, %s611_s19 }
  0x44   : > { %p608_p9 = pnand %p606_p2, %p562_p5  ;;  %p614_p7 = scmp.lt.s32.totalorder %s612_s21, %s605_s28 }
  0x46   : > { %p609_p11 = pneg %p608_p9  ;;  %p615_p3 = por %p614_p7, %p613_p8 }
  0x48   : > { %p616_p6 = pnand %p615_p3, %p609_p11 }
  0x4a   : > { %619 = shalt.err (!%p616_p6)
}
  0x4b   : > { %501 = dma.hbm_to_vmem [thread:$0]  (!%p847_p0), %s892_s22, 32, %s200_s4, %s186_s6  }
  0x4c   : > { %p1050_p13 = scmp.ne.s32.totalorder %s1049_s11, 0 }
  0x4d   : > { %s919_s23 = sand.u32 (!%p1050_p13), 1, %s722_s13   ;;  %p1051_p8 = scmp.ne.s32.totalorder (!%p1050_p13), %s1043_s24, 0 }
  0x4e   : > { %208 = sbr.rel (%p1050_p13) target bundleno = 146 (0x92), region = 28  ;;  %s922_s8 = sshll.u32 (!%p1050_p13), %s919_s23, 1 }
  0x4f   : > { %s211_s10 = scalar_lea.sflag (!%p1050_p13), [#allocation5], %s919_s23  ;;  %s214_s5 = scalar_lea.vmem (!%p1050_p13), [#allocation4], %s922_s8 }
  0x55   : > { %701 = dma.done.wait (%p1051_p8), %s211_s10, 32  }
  0x56   : > { %703 = vsyncadd (%p1051_p8), %s211_s10, 4294967264  ;;  %s220_s9 = scalar_lea.sflag [#allocation8], %s919_s23  ;;  %s223_s11 = scalar_lea.vmem [#allocation7], %s922_s8 }
  0x57   : > { %705 = dma.done.wait (%p1051_p8), %s220_s9, 32  }
  0x58   : > { %707 = vsyncadd (%p1051_p8), %s220_s9, 4294967264  ;;  %v260_v0 = vlaneseq  ;;  %v742_v2 = vmov 0.0   ;;  %v266_v3 = vld [vmem:[%s214_s5] sm:$0x3]  ;;  %v267_v4 = vld [vmem:[%s223_s11] sm:$0x3] }
  0x59   : > { %v268_v5 = vmul.f32 %v267_v4, %v266_v3  ;;  %v269_v6 = vadd.f32 %v267_v4, %v266_v3  ;;  %s248_s24 = scalar_lea.vmem [#allocation9], %s922_s8  ;;  %s255_s4 = scalar_lea.vmem [#allocation10], %s922_s8 }
  0x5a   : > { %vm936_vm0 = vcmp.lt.s32.totalorder %v260_v0, 256  ;;  %s307_s22 = sshll.u32 %s248_s24, 4  ;;  %s321_s6 = sshll.u32 %s255_s4, 4  ;;  %s951_s22 = int_to_ptr.vmem [resolvable:$true] %s307_s22  ;;  %s953_s6 = int_to_ptr.vmem [resolvable:$true] %s321_s6 }
  0x5b   : > { %264 = vst.msk [vmem:[#allocation2] sm:$0x3] %vm936_vm0, %v742_v2  ;;  %265 = vst.msk [vmem:[#allocation3] sm:$0x3] %vm936_vm0, %v742_v2  ;;  %s485_s30 = sshll.u32 %s730_s15, 5  ;;  %s288_s15 = scalar_lea.sflag [#allocation6], %s919_s23 }
  0x5c   : > { %s958_s28 = scalar_lea.hbm %s1038_s2, %s485_s30  ;;  %s963_s21 = scalar_lea.hbm %s1039_s3, %s485_s30 }
  0x5d   : > { %s620_s8 = scalar_lea.vmem %s951_s22, 32  ;;  %p1054_p5 = scmp.ne.s32.totalorder %s1044_s25, 0 }
  0x5e   : > { %p621_p0 = scmp.ne.s32.totalorder %s951_s22, %s620_s8  ;;  %s743_s10 = smov [#allocation9]  }
  0x5f   : > { %s624_s5 = sshll.u32 %s743_s10, 4  ;;  %s625_s5 = int_to_ptr.vmem [resolvable:$false] %s624_s5 }
  0x60   : > { %p622_p7 = pnand %p621_p0, %p1054_p5  ;;  %s626_s9 = scalar_lea.vmem %s625_s5, 64 }
  0x61   : > { %p627_p10 = scmp.lt.s32.totalorder %s951_s22, %s625_s5  ;;  %p628_p12 = scmp.lt.s32.totalorder %s626_s9, %s620_s8 }
  0x62   : > { %v270_v7 = vld [vmem:[#allocation2] sm:$0x3]  ;;  %v277_v8 = vld [vmem:[#allocation3] sm:$0x3]  ;;  %p623_p4 = pneg %p622_p7 }
  0x63   : > { %v271_v9 = vadd.f32 %v270_v7, %v268_v5  ;;  %v278_v10 = vadd.f32 %v277_v8, %v269_v6  ;;  %p629_p1 = por %p628_p12, %p627_p10 }
  0x65   : > { %276 = vst.msk [vmem:[#allocation2] sm:$0x3] %vm936_vm0, %v271_v9  ;;  %279 = vst.msk [vmem:[#allocation3] sm:$0x3] %vm936_vm0, %v278_v10  ;;  %p630_p2 = pnand %p629_p1, %p623_p4 }
  0x6c   : > { %v283_v11 = vld [vmem:[#allocation2] sm:$0x3]  ;;  %v285_v12 = vld [vmem:[#allocation3] sm:$0x3] }
  0x6d   : > { %284 = vst.msk [vmem:[%s248_s24] sm:$0x3] %vm936_vm0, %v283_v11  ;;  %286 = vst.msk [vmem:[%s255_s4] sm:$0x3] %vm936_vm0, %v285_v12 }
  0x6e   : > { %633 = shalt.err (!%p630_p2)
}
  0x6f   : > { %s634_s11 = scalar_lea.hbm %s958_s28, 32  ;;  %s638_s30 = scalar_lea.hbm %s1038_s2, 64 }
  0x70   : > { %p635_p9 = scmp.ne.s32.totalorder %s958_s28, %s634_s11  ;;  %p639_p6 = scmp.lt.u32.totalorder %s958_s28, %s1038_s2 }
  0x71   : > { %p640_p13 = scmp.lt.u32.totalorder %s638_s30, %s634_s11  ;;  %p642_p0 = scmp.lt.u32.totalorder %s634_s11, %s958_s28 }
  0x72   : > { %p636_p11 = pnand %p635_p9, %p1054_p5 }
  0x73   : > { %p641_p8 = por %p640_p13, %p639_p6 }
  0x74   : > { %p637_p3 = pneg %p636_p11 }
  0x75   : > { %p643_p7 = por %p642_p0, %p641_p8 }
  0x77   : > { %p644_p4 = pnand %p643_p7, %p637_p3 }
  0x79   : > { %647 = shalt.err (!%p644_p4)
}
  0x7a   : > { %491 = dma.vmem_to_hbm [thread:$0]  (%p1054_p5), %s951_s22, 32, %s958_s28, %s288_s15  }
  0x7b   : > { %s293_s29 = scalar_lea.sflag [#allocation11], %s919_s23  ;;  %s648_s19 = scalar_lea.vmem %s953_s6, 32 }
  0x7c   : > { %p649_p10 = scmp.ne.s32.totalorder %s953_s6, %s648_s19  ;;  %s744_s8 = smov [#allocation10]  }
  0x7d   : > { %s652_s10 = sshll.u32 %s744_s8, 4  ;;  %s653_s10 = int_to_ptr.vmem [resolvable:$false] %s652_s10 }
  0x7e   : > { %p650_p12 = pnand %p649_p10, %p1054_p5  ;;  %s654_s5 = scalar_lea.vmem %s653_s10, 64 }
  0x7f   : > { %p655_p2 = scmp.lt.s32.totalorder %s953_s6, %s653_s10  ;;  %p656_p9 = scmp.lt.s32.totalorder %s654_s5, %s648_s19 }
  0x80   : > { %p651_p1 = pneg %p650_p12 }
  0x81   : > { %p657_p11 = por %p656_p9, %p655_p2 }
  0x83   : > { %p658_p3 = pnand %p657_p11, %p651_p1 }
  0x85   : > { %661 = shalt.err (!%p658_p3)
}
  0x86   : > { %s662_s23 = scalar_lea.hbm %s963_s21, 32  ;;  %s666_s15 = scalar_lea.hbm %s1039_s3, 64 }
  0x87   : > { %p663_p6 = scmp.ne.s32.totalorder %s963_s21, %s662_s23  ;;  %p667_p0 = scmp.lt.u32.totalorder %s963_s21, %s1039_s3 }
  0x88   : > { %p668_p7 = scmp.lt.u32.totalorder %s666_s15, %s662_s23  ;;  %p670_p10 = scmp.lt.u32.totalorder %s662_s23, %s963_s21 }
  0x89   : > { %p664_p13 = pnand %p663_p6, %p1054_p5 }
  0x8a   : > { %p669_p4 = por %p668_p7, %p667_p0 }
  0x8b   : > { %p665_p8 = pneg %p664_p13 }
  0x8c   : > { %p671_p12 = por %p670_p10, %p669_p4 }
  0x8e   : > { %p672_p1 = pnand %p671_p12, %p665_p8 }
  0x90   : > { %675 = shalt.err (!%p672_p1)
}
  0x91   : > { %492 = dma.vmem_to_hbm [thread:$0]  (%p1054_p5), %s953_s6, 32, %s963_s21, %s293_s29  }
  0x92 PF: > { %s333_s24 = sand.u32 1, %s718_s12   ;;  %p1055_p2 = scmp.ne.s32.totalorder %s1045_s27, 0 }
  0x93   : > { %p1056_p9 = scmp.ge.s32.totalorder %s738_s17, 2  ;;  %s334_s4 = scalar_lea.sflag [#allocation6], %s333_s24 }
  0x95   : > { %p503_p11 = pnand %p1056_p9, %p1055_p2 }
  0x97   : > { %709 = dma.done.wait (!%p503_p11), %s334_s4, 32  }
  0x98   : > { %711 = vsyncadd (!%p503_p11), %s334_s4, 4294967264  ;;  %s343_s30 = scalar_lea.sflag [#allocation11], %s333_s24 }
  0x99   : > { %713 = dma.done.wait (!%p503_p11), %s343_s30, 32  }
  0x9a   : > { %715 = vsyncadd (!%p503_p11), %s343_s30, 4294967264  ;;  %s26_s17 = sadd.s32 1, %s738_s17   ;;  %s1057_s12 = smov %s722_s13 }
  0x9b   : > { %p23_p3 = scmp.ge.s32.totalorder %s26_s17, 4   ;;  %s1058_s13 = smov %s726_s14 }
  0x9c   : > { %s1059_s14 = smov %s821_s26  ;;  %s1060_s15 = smov %s734_s16 }
  0x9d   : > { %s1061_s16 = smov %s1063_s20  ;;  %25 = sbr.rel (!%p23_p3) target bundleno = 10 (0xa), region = 111 }
  0xa4   :  { %348 = vsyncpa [#allocation5], 1 }
  0xa5   :  { %350 = vsyncpa [#allocation5 + $0x1], 1 }
  0xa6   :  { %351 = vsyncpa [#allocation8], 1 }
  0xa7   :  { %353 = vsyncpa [#allocation8 + $0x1], 1 }
  0xa8   :  { %354 = vsyncpa [#allocation6], 1 }
  0xa9   :  { %356 = vsyncpa [#allocation6 + $0x1], 1 }
  0xaa   :  { %357 = vsyncpa [#allocation11], 1 }
  0xab   :  { %359 = vsyncpa [#allocation11 + $0x1], 1 }

</bundles_post_ra>
